<compile_context>
chip_gen: v7x
topology: tpu7x:2x2x1
jax: 0.10.0
libtpu: 0.0.40
codegen_flags: <defaults>
</compile_context>

<pallas_src>
import jax
import jax.numpy as jnp
from jax.experimental import pallas as pl
from jax.experimental.pallas import tpu as pltpu


def _round_up(n, m):
    return ((n + m - 1) // m) * m


def _model_kernel(x_ref, wc_ref, bc_ref, o_ref):
    # x_ref:  (3, TB)   batch on the lane axis -> lane-dense compute & stores
    # wc_ref: (24, 3)   combined weights (w1[i] + w2[j]), resident in VMEM
    # bc_ref: (24, 1)   combined bias   (b1[i] + b2[j]), resident in VMEM
    # o_ref:  (24, TB)  flattened (4*6, TB); 24 rows = 3 x 8 sublanes
    x = x_ref[...]
    wc = wc_ref[...]

    # K = 3 -> plain VPU broadcast-FMAs; the MXU would be ~0% utilized here,
    # and the kernel is HBM/DMA-bound anyway (these ops are filler).
    acc = bc_ref[...] + wc[:, 0:1] * x[0:1, :]            # (24, TB)
    for k in range(1, 3):                                  # static unroll, K == 3
        acc = acc + wc[:, k:k + 1] * x[k:k + 1, :]

    o_ref[...] = acc.astype(o_ref.dtype)


def model_forward(x, w1, b1, w2, b2, *, tb=4096, batch_major=False,
                  out_dtype=jnp.float32):
    """x: (B, 3) f32.  w1: (4, 3), b1: (4,), w2: (6, 3), b2: (6,) (torch layout).

    Returns the outer-broadcast sum, lane-dense (4, 6, B) by default
    (free reshape of the kernel output); (B, 4, 6) if `batch_major=True`.
    """
    x = jnp.asarray(x, jnp.float32)
    B = x.shape[0]

    # Tile size: multiple of 128 lanes; large (default 4096) to amortize the
    # ~0.35us per-grid-step overhead, but capped so there are >= 2 grid steps
    # when B allows (v7x shards the "parallel" batch axis across its 2 TCs).
    TB = min(_round_up(tb, 128), _round_up(max(B, 1), 128))
    if _round_up(B, 128) >= 256:
        TB = min(TB, _round_up(pl.cdiv(B, 2), 128))
    grid = (pl.cdiv(B, TB),)

    w1 = jnp.asarray(w1, jnp.float32)                      # (4, 3)
    w2 = jnp.asarray(w2, jnp.float32)                      # (6, 3)
    b1 = jnp.asarray(b1, jnp.float32)                      # (4,)
    b2 = jnp.asarray(b2, jnp.float32)                      # (6,)

    # Fold both linears + outer-broadcast add into ONE 3 -> 24 linear:
    #   out[b, i*6+j] = x[b] . (w1[i] + w2[j]) + (b1[i] + b2[j])
    wc = jnp.repeat(w1, 6, axis=0) + jnp.tile(w2, (4, 1))          # (24, 3)
    bc = (jnp.repeat(b1, 6) + jnp.tile(b2, 4))[:, None]            # (24, 1)

    # Single small HBM pass to put batch on the lane axis (12+12 B/row vs the
    # kernel's ~108 B/row).  No padding: ragged last tile is masked by Pallas.
    x_t = x.T                                                       # (3, B)

    out = pl.pallas_call(
        _model_kernel,
        out_shape=jax.ShapeDtypeStruct((24, B), out_dtype),
        grid=grid,
        in_specs=[
            pl.BlockSpec((3, TB), lambda i: (0, i)),       # x tile
            pl.BlockSpec((24, 3), lambda i: (0, 0)),       # combined weights
            pl.BlockSpec((24, 1), lambda i: (0, 0)),       # combined bias
        ],
        out_specs=pl.BlockSpec((24, TB), lambda i: (0, i)),
        compiler_params=pltpu.CompilerParams(
            dimension_semantics=("parallel",)),
    )(x_t, wc, bc)

    # (24, B) -> (4, 6, B): row-major compatible, i.e. a FREE metadata reshape.
    out = out.reshape(4, 6, B)

    if batch_major:
        # Torch-style (B, 4, 6).  NOTE: this transpose is a full extra HBM
        # read+write of the output (~2-3x the kernel's traffic); prefer the
        # lane-dense (4, 6, B) layout whenever the consumer tolerates it.
        out = jnp.transpose(out, (2, 0, 1))
    return out


def _reference(x, w1, b1, w2, b2):
    v1 = x @ w1.T + b1
    v2 = x @ w2.T + b2
    return v1[:, :, None] + v2[:, None, :]         # (B, 4, 6)


if __name__ == "__main__":
    key = jax.random.PRNGKey(0)
    kx, k1w, k1b, k2w, k2b = jax.random.split(key, 5)

    IN = 3
    # Deterministic param init mimicking torch.nn.Linear (uniform +-1/sqrt(in)).
    bound = 1.0 / (IN ** 0.5)
    w1 = jax.random.uniform(k1w, (4, IN), jnp.float32, -bound, bound)
    b1 = jax.random.uniform(k1b, (4,), jnp.float32, -bound, bound)
    w2 = jax.random.uniform(k2w, (6, IN), jnp.float32, -bound, bound)
    b2 = jax.random.uniform(k2b, (6,), jnp.float32, -bound, bound)

    # Small-shape test (single grid step).
    B = 8
    x = jax.random.normal(kx, (B, IN), dtype=jnp.float32)
    ref = _reference(x, w1, b1, w2, b2)                           # (B, 4, 6)

    out = model_forward(x, w1, b1, w2, b2)                        # (4, 6, B)
    jax.block_until_ready(out)
    assert out.shape == (4, 6, B)
    assert jnp.allclose(out, jnp.transpose(ref, (1, 2, 0)), atol=1e-5, rtol=1e-5)

    out_bm = model_forward(x, w1, b1, w2, b2, batch_major=True)   # (B, 4, 6)
    jax.block_until_ready(out_bm)
    assert out_bm.shape == (B, 4, 6)
    assert jnp.allclose(out_bm, ref, atol=1e-5, rtol=1e-5)

    # Multi-tile + ragged last tile (grid of 3, resident params, masked writes).
    B2 = 300
    x2 = jax.random.normal(jax.random.PRNGKey(1), (B2, IN), dtype=jnp.float32)
    out2 = model_forward(x2, w1, b1, w2, b2, tb=128)
    jax.block_until_ready(out2)
    ref2 = _reference(x2, w1, b1, w2, b2)
    assert out2.shape == (4, 6, B2)
    assert jnp.allclose(out2, jnp.transpose(ref2, (1, 2, 0)), atol=1e-5, rtol=1e-5)

    # Large-tile path: TB capped so the grid keeps >= 2 steps (v7x megacore).
    B3 = 5000
    x3 = jax.random.normal(jax.random.PRNGKey(2), (B3, IN), dtype=jnp.float32)
    out3 = model_forward(x3, w1, b1, w2, b2)                      # tb=4096 default
    jax.block_until_ready(out3)
    ref3 = _reference(x3, w1, b1, w2, b2)
    assert out3.shape == (4, 6, B3)
    assert jnp.allclose(out3, jnp.transpose(ref3, (1, 2, 0)), atol=1e-5, rtol=1e-5)

    # Optional bf16 output (halves the dominant output HBM traffic).
    out_bf16 = model_forward(x2, w1, b1, w2, b2, out_dtype=jnp.bfloat16)
    jax.block_until_ready(out_bf16)
    assert out_bf16.shape == (4, 6, B2) and out_bf16.dtype == jnp.bfloat16
    assert bool(jnp.all(jnp.isfinite(out_bf16.astype(jnp.float32))))

    print("KERNEL_OK")
</pallas_src>

<mosaic_0001>
module attributes {stable_mosaic.version = 11 : i64} {
  func.func @_model_kernel(%arg0: i32, %arg1: memref<3x128xf32, #tpu.memory_space<vmem>>, %arg2: memref<24x3xf32, #tpu.memory_space<vmem>>, %arg3: memref<24x1xf32, #tpu.memory_space<vmem>>, %arg4: memref<24x128xf32, #tpu.memory_space<vmem>>) attributes {dimension_semantics = [#tpu.dimension_semantics<parallel>], iteration_bounds = array<i64: 1>, scalar_prefetch = 0 : i64, scratch_operands = 0 : i64, tpu.core_type = #tpu.core_type<tc>, window_params = [{transform_indices = @transform_0, window_bounds = array<i64: 3, 128>}, {pipeline_mode = #tpu.pipeline_mode<synchronous>, transform_indices = @transform_1, window_bounds = array<i64: 24, 3>}, {pipeline_mode = #tpu.pipeline_mode<synchronous>, transform_indices = @transform_2, window_bounds = array<i64: 24, 1>}, {transform_indices = @transform_3, window_bounds = array<i64: 24, 128>}]} {
    %c0 = arith.constant 0 : index
    %c0_0 = arith.constant 0 : index
    %0 = vector.load %arg1[%c0, %c0_0] : memref<3x128xf32, #tpu.memory_space<vmem>>, vector<3x128xf32>
    %c0_1 = arith.constant 0 : index
    %c0_2 = arith.constant 0 : index
    %1 = vector.load %arg2[%c0_1, %c0_2] : memref<24x3xf32, #tpu.memory_space<vmem>>, vector<24x3xf32>
    %c0_3 = arith.constant 0 : index
    %c0_4 = arith.constant 0 : index
    %2 = vector.load %arg3[%c0_3, %c0_4] : memref<24x1xf32, #tpu.memory_space<vmem>>, vector<24x1xf32>
    %3 = vector.extract_strided_slice %1 {offsets = [0, 0], sizes = [24, 1], strides = [1, 1]} : vector<24x3xf32> to vector<24x1xf32>
    %4 = vector.extract_strided_slice %0 {offsets = [0, 0], sizes = [1, 128], strides = [1, 1]} : vector<3x128xf32> to vector<1x128xf32>
    %5 = vector.broadcast %3 : vector<24x1xf32> to vector<24x128xf32>
    %6 = vector.broadcast %4 : vector<1x128xf32> to vector<24x128xf32>
    %7 = arith.mulf %5, %6 : vector<24x128xf32>
    %8 = vector.broadcast %2 : vector<24x1xf32> to vector<24x128xf32>
    %9 = arith.addf %8, %7 : vector<24x128xf32>
    %10 = vector.extract_strided_slice %1 {offsets = [0, 1], sizes = [24, 1], strides = [1, 1]} : vector<24x3xf32> to vector<24x1xf32>
    %11 = vector.extract_strided_slice %0 {offsets = [1, 0], sizes = [1, 128], strides = [1, 1]} : vector<3x128xf32> to vector<1x128xf32>
    %12 = vector.broadcast %10 : vector<24x1xf32> to vector<24x128xf32>
    %13 = vector.broadcast %11 : vector<1x128xf32> to vector<24x128xf32>
    %14 = arith.mulf %12, %13 : vector<24x128xf32>
    %15 = arith.addf %9, %14 : vector<24x128xf32>
    %16 = vector.extract_strided_slice %1 {offsets = [0, 2], sizes = [24, 1], strides = [1, 1]} : vector<24x3xf32> to vector<24x1xf32>
    %17 = vector.extract_strided_slice %0 {offsets = [2, 0], sizes = [1, 128], strides = [1, 1]} : vector<3x128xf32> to vector<1x128xf32>
    %18 = vector.broadcast %16 : vector<24x1xf32> to vector<24x128xf32>
    %19 = vector.broadcast %17 : vector<1x128xf32> to vector<24x128xf32>
    %20 = arith.mulf %18, %19 : vector<24x128xf32>
    %21 = arith.addf %15, %20 : vector<24x128xf32>
    %c0_5 = arith.constant 0 : index
    %c0_6 = arith.constant 0 : index
    %22 = vector.load %arg4[%c0_5, %c0_6] : memref<24x128xf32, #tpu.memory_space<vmem>>, vector<24x128xf32>
    tpu.vector_store %arg4[%c0_5, %c0_6], %21 {strides = array<i32>} : memref<24x128xf32, #tpu.memory_space<vmem>>, vector<24x128xf32>,
    return
  }
  func.func @transform_0(%arg0: i32) -> (i32, i32) {
    %c0_i32 = arith.constant 0 : i32
    %c0_i32_0 = arith.constant 0 : i32
    return %c0_i32, %arg0 : i32, i32
  }
  func.func @transform_1(%arg0: i32) -> (i32, i32) {
    %c0_i32 = arith.constant 0 : i32
    %c0_i32_0 = arith.constant 0 : i32
    %c0_i32_1 = arith.constant 0 : i32
    return %c0_i32, %c0_i32_0 : i32, i32
  }
  func.func @transform_2(%arg0: i32) -> (i32, i32) {
    %c0_i32 = arith.constant 0 : i32
    %c0_i32_0 = arith.constant 0 : i32
    %c0_i32_1 = arith.constant 0 : i32
    return %c0_i32, %c0_i32_0 : i32, i32
  }
  func.func @transform_3(%arg0: i32) -> (i32, i32) {
    %c0_i32 = arith.constant 0 : i32
    %c0_i32_0 = arith.constant 0 : i32
    return %c0_i32, %arg0 : i32, i32
  }
}

</mosaic_0001>

<bundles_post_ra>
// kernel: tpu_custom_call.1
= control target key start
LH: loop header
LB: loop body
LE: loop exit
PB: predicated region body
PF: predicated region fallthrough
CT: control target
= control target key end

     0   :  { %v121_v0 = vmov 0   ;;  %v122_v7 = vmov 1   ;;  %v123_v8 = vmov 2   ;;  %v36_v9 = vlaneseq  ;;  %s174_s1 = inlined_call_operand.vmem [shape: f32[24,3], index: 1, kind: input, shape index: {}]   ;;  %s175_s2 = inlined_call_operand.vmem [shape: f32[24,1], index: 2, kind: input, shape index: {}]   ;;  %s176_s0 = inlined_call_operand.vmem [shape: f32[3,8], index: 0, kind: input, shape index: {}]   ;;  %s177_s3 = inlined_call_operand.vmem [shape: f32[24,8], index: 3, kind: output, shape index: {}]  }
   0x1   :  { %116 = vset.pattern.permute.xlu1 %v121_v0  ;;  %115 = vset.pattern.permute.xlu0 %v121_v0  ;;  %v17_v1 = vld [vmem:[%s174_s1 + $0x10] sm:$0xff]  ;;  %v15_v2 = vld [vmem:[%s174_s1] sm:$0xff]  ;;  %v16_v4 = vld [vmem:[%s174_s1 + $0x8] sm:$0xff] }
   0x2   :  { %33 = vperm.xlu1 %116, %v17_v1   ;;  %23 = vperm.xlu0 %115, %v15_v2   ;;  %v18_v3 = vld [vmem:[%s175_s2] sm:$0xff]  ;;  %v20_v5 = vld [vmem:[%s175_s2 + $0x10] sm:$0xff]  ;;  %v19_v6 = vld [vmem:[%s175_s2 + $0x8] sm:$0xff]  ;;  %v37_v12 = vshrl.u32 %v36_v9, 7 }
   0x3   :  { %v14_v17 = vld [vmem:[%s176_s0] sm:$0x7] }
   0x4   :  { %v38_v15 = vsub.s32 0, %v37_v12  ;;  %v75_v16 = vsub.s32 1, %v37_v12  ;;  %v97_v22 = vsub.s32 2, %v37_v12 }
   0x6   :  { %45 = vperm.xlu1 %116, %v18_v3   ;;  %28 = vperm.xlu0 %115, %v16_v4   ;;  %v39_v20 = vrot.slane %v14_v17, %v38_v15  ;;  %v76_v21 = vrot.slane %v14_v17, %v75_v16  ;;  %v98_v27 = vrot.slane %v14_v17, %v97_v22 }
   0xa   :  { %55 = vperm.xlu1 %116, %v20_v5   ;;  %50 = vperm.xlu0 %115, %v19_v6  }
   0xe   :  { %118 = vset.pattern.permute.xlu1 %v122_v7  ;;  %117 = vset.pattern.permute.xlu0 %v122_v7 }
   0xf   :  { %66 = vperm.xlu1 %118, %v16_v4   ;;  %62 = vperm.xlu0 %117, %v15_v2  }
  0x13   :  { %70 = vperm.xlu1 %118, %v17_v1   ;;  %119 = vset.pattern.permute.xlu0 %v123_v8 }
  0x14   :  { %84 = vperm.xlu0 %119, %v15_v2  }
  0x17   :  { %120 = vset.pattern.permute.xlu1 %v123_v8 }
  0x18   :  { %88 = vperm.xlu1 %120, %v16_v4  }
  0x1c   :  { %92 = vperm.xlu1 %120, %v17_v1  }
  0x81   :  { %v34_v10 = vpop.permute.xlu1 %33  ;;  %v24_v11 = vpop.permute.xlu0 %23 }
  0x82   :  { %v40_v23 = vmul.f32 %v39_v20, %v24_v11  ;;  %v42_v38 = vmul.f32 %v39_v20, %v34_v10 }
  0x85   :  { %v46_v13 = vpop.permute.xlu1 %45  ;;  %v29_v14 = vpop.permute.xlu0 %28 }
  0x86   :  { %v58_v28 = vadd.f32 %v46_v13, %v40_v23  ;;  %v41_v29 = vmul.f32 %v39_v20, %v29_v14 }
  0x89   :  { %v56_v18 = vpop.permute.xlu1 %55  ;;  %v51_v19 = vpop.permute.xlu0 %50 }
  0x8a   :  { %v59_v35 = vadd.f32 %v51_v19, %v41_v29  ;;  %v60_v42 = vadd.f32 %v56_v18, %v42_v38 }
  0x8e   :  { %v67_v24 = vpop.permute.xlu1 %66  ;;  %v63_v25 = vpop.permute.xlu0 %62 }
  0x8f   :  { %v77_v26 = vmul.f32 %v76_v21, %v63_v25  ;;  %v78_v32 = vmul.f32 %v76_v21, %v67_v24 }
  0x91   :  { %v80_v33 = vadd.f32 %v77_v26, %v58_v28  ;;  %v81_v39 = vadd.f32 %v78_v32, %v59_v35 }
  0x92   :  { %v71_v30 = vpop.permute.xlu1 %70 }
  0x93   :  { %v85_v31 = vpop.permute.xlu0 %84  ;;  %v79_v40 = vmul.f32 %v76_v21, %v71_v30 }
  0x94   :  { %v99_v34 = vmul.f32 %v98_v27, %v85_v31 }
  0x95   :  { %v82_v45 = vadd.f32 %v79_v40, %v60_v42 }
  0x96   :  { %v102_v36 = vadd.f32 %v99_v34, %v80_v33 }
  0x97   :  { %v89_v37 = vpop.permute.xlu1 %88 }
  0x98   :  { %105 = vst [vmem:[%s177_s3] sm:$0xff] %v102_v36  ;;  %v100_v41 = vmul.f32 %v98_v27, %v89_v37 }
  0x9a   :  { %v103_v43 = vadd.f32 %v100_v41, %v81_v39 }
  0x9b   :  { %v93_v44 = vpop.permute.xlu1 %92 }
  0x9c   :  { %106 = vst [vmem:[%s177_s3 + $0x8] sm:$0xff] %v103_v43  ;;  %v101_v46 = vmul.f32 %v98_v27, %v93_v44 }
  0x9e   :  { %v104_v47 = vadd.f32 %v101_v46, %v82_v45 }
  0xa0   :  { %107 = vst [vmem:[%s177_s3 + $0x10] sm:$0xff] %v104_v47 }

</bundles_post_ra>
